<compile_context>
chip_gen: v7x
topology: tpu7x:2x2x1
jax: 0.10.0
libtpu: 0.0.40
codegen_flags: <defaults>
</compile_context>

<pallas_src>
import jax
import jax.numpy as jnp
from jax.experimental import pallas as pl
from jax.experimental.pallas import tpu as pltpu

LANE = 128
SUBLANE = 8


def _round_up(x, m):
    return (x + m - 1) // m * m


def _vmem_limit_bytes():
    phys = None
    try:
        phys = getattr(pltpu.get_tpu_info(), "vmem_capacity_bytes", None)
    except Exception:
        phys = None
    if not phys:
        phys = 64 * 1024 * 1024            # assume the smallest (v7x) if unknown
    # ~62% of physical (40 MiB on v7x, 80 MiB on v5e/v6e), capped at 100 MiB.
    return int(min(phys * 5 // 8, 100 * 1024 * 1024))


def _make_kernel(inv_hw, n_pad_rows):
    def kernel(p_ref, w_ref, b_ref, o_ref, acc_ref):
        # p_ref : (hw_tile, Kp) bf16 im2col rows of one sample / one hw tile
        # w_ref : (Kp, TN)      bf16 conv weights (resident across hw steps)
        # b_ref : (1, TN)       f32 bias
        # o_ref : (1, TN)       f32 pooled embedding tile
        # acc_ref:(1, TN)       f32 running GAP sum (VMEM scratch)
        h = pl.program_id(2)

        @pl.when(h == 0)
        def _init():
            acc_ref[...] = jnp.zeros_like(acc_ref)

        # Single lane-dense MXU matmul: M = hw_tile, K = Kp, N = TN (bf16 in, f32 acc).
        y = jnp.dot(p_ref[...], w_ref[...], preferred_element_type=jnp.float32)
        y = jnp.maximum(y + b_ref[...], 0.0)                # bias + ReLU epilogue (f32 VPU)
        acc_ref[...] += jnp.sum(y, axis=0, keepdims=True)   # partial GAP sum

        @pl.when(h == pl.num_programs(2) - 1)
        def _finalize():
            res = acc_ref[...]
            if n_pad_rows:   # zero-padded rows each contributed ReLU(bias); remove them
                res = res - float(n_pad_rows) * jnp.maximum(b_ref[...], 0.0)
            o_ref[...] = (res * inv_hw).astype(o_ref.dtype)

    return kernel


def embedding_coinnet_forward(x_nchw, weight, bias):
    """x_nchw: (B, Cin, H, W) -> per-sample embedding (B, Cout) f32."""
    B, Cin, H, W = x_nchw.shape
    Cout = weight.shape[-1]
    HW = H * W
    K = 9 * Cin

    Kp = _round_up(K, LANE)                    # lane-dense contraction dim
    Cout_p = _round_up(Cout, LANE)

    # N tile: keep the whole weight resident (n axis length 1) when it is small so
    # the patch stream is read from HBM only once; else 256-wide tiles (v6e/v7x MXU).
    if Kp * Cout_p * 2 <= 2 * 1024 * 1024:
        tn = Cout_p
    elif Cout_p % 256 == 0:
        tn = 256
    else:
        tn = LANE
    n_tiles = Cout_p // tn

    # hw tile: big enough to amortize per-grid-step overhead, small enough that
    # 2x bf16 patch buffers + the f32 (hw_tile, tn) activation stay a few MiB.
    PATCH_BUDGET = 4 * 1024 * 1024             # per pipeline buffer (bf16)
    ACT_BUDGET = 4 * 1024 * 1024               # f32 matmul output tile
    hw_tile = min(PATCH_BUDGET // (Kp * 2), ACT_BUDGET // (4 * tn))
    hw_tile = max(hw_tile, 512)
    hw_tile = (hw_tile // SUBLANE) * SUBLANE
    hw_pad8 = _round_up(HW, SUBLANE)
    if hw_tile >= hw_pad8:
        hw_tile = hw_pad8
    n_hw = -(-HW // hw_tile)                   # cdiv
    hw_full = n_hw * hw_tile
    n_pad_rows = hw_full - HW

    # ---- layout plumbing done once in XLA (not compute hoisting) ----
    # NCHW -> NHWC, zero spatial pad (Conv2d padding=1), im2col ordered (ky, kx, cin).
    # TODO(synk): for tiny Cin the im2col slab is ~Kp/(9*Cin)x the input bytes; building
    # the 9 taps in-kernel from a DMA'd halo tile would remove that HBM round trip.
    x = jnp.transpose(x_nchw, (0, 2, 3, 1)).astype(jnp.float32)
    xp = jnp.pad(x, ((0, 0), (1, 1), (1, 1), (0, 0)))
    taps = [xp[:, ky:ky + H, kx:kx + W, :] for ky in range(3) for kx in range(3)]
    patches = jnp.concatenate(taps, axis=-1).reshape(B, HW, K)
    # bf16 patches/weights halve the dominant HBM read; accumulation stays f32.
    patches = jnp.pad(patches, ((0, 0), (0, hw_full - HW), (0, Kp - K)))
    patches = patches.astype(jnp.bfloat16)

    w_flat = weight.reshape(K, Cout).astype(jnp.float32)
    w_p = jnp.pad(w_flat, ((0, Kp - K), (0, Cout_p - Cout))).astype(jnp.bfloat16)
    b_p = jnp.pad(bias.astype(jnp.float32), (0, Cout_p - Cout)).reshape(1, Cout_p)

    grid = (B, n_tiles, n_hw)                  # hw reduction axis last ("arbitrary")
    kernel = _make_kernel(1.0 / HW, n_pad_rows)

    out = pl.pallas_call(
        kernel,
        out_shape=jax.ShapeDtypeStruct((B, 1, Cout_p), jnp.float32),
        grid_spec=pltpu.PrefetchScalarGridSpec(
            num_scalar_prefetch=0,
            grid=grid,
            in_specs=[
                pl.BlockSpec((None, hw_tile, Kp), lambda b, n, h: (b, h, 0)),
                pl.BlockSpec((Kp, tn), lambda b, n, h: (0, n)),
                pl.BlockSpec((1, tn), lambda b, n, h: (0, n)),
            ],
            out_specs=pl.BlockSpec((None, 1, tn), lambda b, n, h: (b, 0, n)),
            scratch_shapes=[pltpu.VMEM((1, tn), jnp.float32)],
        ),
        compiler_params=pltpu.CompilerParams(
            dimension_semantics=("parallel", "parallel", "arbitrary"),
            vmem_limit_bytes=_vmem_limit_bytes(),
        ),
    )(patches, w_p, b_p)

    return out.reshape(B, Cout_p)[:, :Cout]


def _reference(x_nchw, weight, bias):
    """Plain-JAX f32 reference (same math, no Pallas)."""
    B, Cin, H, W = x_nchw.shape
    Cout = weight.shape[-1]
    x = jnp.transpose(x_nchw, (0, 2, 3, 1))
    xp = jnp.pad(x, ((0, 0), (1, 1), (1, 1), (0, 0)))
    acc = jnp.zeros((B, H, W, Cout), jnp.float32)
    for ky in range(3):
        for kx in range(3):
            patch = xp[:, ky:ky + H, kx:kx + W, :]
            acc = acc + jnp.einsum("bhwc,co->bhwo", patch, weight[ky, kx])
    act = jnp.maximum(acc + bias[None, None, None, :], 0.0)
    return jnp.mean(act, axis=(1, 2))


if __name__ == "__main__":
    key = jax.random.PRNGKey(0)
    k_x, k_w, k_b = jax.random.split(key, 3)

    B, Cin, H, W = 2, 4, 16, 16
    Cout = 32

    x = jax.random.normal(k_x, (B, Cin, H, W), dtype=jnp.float32)
    weight = 0.1 * jax.random.normal(k_w, (3, 3, Cin, Cout), dtype=jnp.float32)
    bias = 0.01 * jax.random.normal(k_b, (Cout,), dtype=jnp.float32)

    feats = embedding_coinnet_forward(x, weight, bias)
    feats = jax.block_until_ready(feats)

    ref = _reference(x, weight, bias)
    assert feats.shape == (B, Cout)
    # bf16 matmul inputs (per the perf review) -> loosened tolerance vs f32 reference.
    assert jnp.allclose(feats, ref, atol=3e-2, rtol=3e-2)

    print("KERNEL_OK")
</pallas_src>

<mosaic_0001>
module attributes {stable_mosaic.version = 11 : i64} {
  func.func @kernel(%arg0: i32, %arg1: i32, %arg2: i32, %arg3: memref<1x256x128xbf16, #tpu.memory_space<vmem>>, %arg4: memref<128x128xbf16, #tpu.memory_space<vmem>>, %arg5: memref<1x128xf32, #tpu.memory_space<vmem>>, %arg6: memref<1x1x128xf32, #tpu.memory_space<vmem>>, %arg7: memref<1x128xf32, #tpu.memory_space<vmem>>) attributes {dimension_semantics = [#tpu.dimension_semantics<parallel>, #tpu.dimension_semantics<parallel>, #tpu.dimension_semantics<arbitrary>], iteration_bounds = array<i64: 2, 1, 1>, scalar_prefetch = 0 : i64, scratch_operands = 1 : i64, tpu.core_type = #tpu.core_type<tc>, window_params = [{transform_indices = @transform_0, window_bounds = array<i64: 1, 256, 128>}, {transform_indices = @transform_1, window_bounds = array<i64: 128, 128>}, {transform_indices = @transform_2, window_bounds = array<i64: 1, 128>}, {transform_indices = @transform_3, window_bounds = array<i64: 1, 1, 128>}]} {
    %c0_i32 = arith.constant 0 : i32
    %0 = arith.cmpi eq, %arg2, %c0_i32 : i32
    %1 = arith.extui %0 : i1 to i32
    %c0_i32_0 = arith.constant 0 : i32
    %2 = arith.cmpi ne, %1, %c0_i32_0 : i32
    scf.if %2 {
      %cst_15 = arith.constant 0.000000e+00 : f32
      %20 = vector.broadcast %cst_15 : f32 to vector<1x128xf32>
      %c0_16 = arith.constant 0 : index
      %c0_17 = arith.constant 0 : index
      %21 = vector.load %arg7[%c0_16, %c0_17] : memref<1x128xf32, #tpu.memory_space<vmem>>, vector<1x128xf32>
      tpu.vector_store %arg7[%c0_16, %c0_17], %20 {strides = array<i32>} : memref<1x128xf32, #tpu.memory_space<vmem>>, vector<1x128xf32>,
    } else {
    }
    %c0 = arith.constant 0 : index
    %c0_1 = arith.constant 0 : index
    %c0_2 = arith.constant 0 : index
    %3 = vector.load %arg3[%c0, %c0_1, %c0_2] : memref<1x256x128xbf16, #tpu.memory_space<vmem>>, vector<1x256x128xbf16>
    %4 = vector.shape_cast %3 : vector<1x256x128xbf16> to vector<256x128xbf16>
    %c0_3 = arith.constant 0 : index
    %c0_4 = arith.constant 0 : index
    %5 = vector.load %arg4[%c0_3, %c0_4] : memref<128x128xbf16, #tpu.memory_space<vmem>>, vector<128x128xbf16>
    %cst = arith.constant dense<0.000000e+00> : vector<256x128xf32>
    %6 = tpu.matmul %4, %5, %cst {dimension_numbers = #tpu.dot_dimension_numbers<[1], [0], [0], [1], [0, 0, 1, 1], [], []>} : vector<256x128xbf16>, vector<128x128xbf16>, vector<256x128xf32> -> vector<256x128xf32>
    %c0_5 = arith.constant 0 : index
    %c0_6 = arith.constant 0 : index
    %7 = vector.load %arg5[%c0_5, %c0_6] : memref<1x128xf32, #tpu.memory_space<vmem>>, vector<1x128xf32>
    %8 = vector.broadcast %7 : vector<1x128xf32> to vector<256x128xf32>
    %9 = arith.addf %6, %8 : vector<256x128xf32>
    %cst_7 = arith.constant 0.000000e+00 : f32
    %10 = vector.broadcast %cst_7 : f32 to vector<256x128xf32>
    %11 = arith.maximumf %9, %10 : vector<256x128xf32>
    %c0_8 = arith.constant 0 : index
    %c0_9 = arith.constant 0 : index
    %12 = vector.load %arg7[%c0_8, %c0_9] : memref<1x128xf32, #tpu.memory_space<vmem>>, vector<1x128xf32>
    %cst_10 = arith.constant dense<0.000000e+00> : vector<128xf32>
    %13 = vector.multi_reduction <add>, %11, %cst_10 [0] : vector<256x128xf32> to vector<128xf32>
    %14 = vector.shape_cast %13 : vector<128xf32> to vector<1x128xf32>
    %15 = arith.addf %12, %14 : vector<1x128xf32>
    %c0_11 = arith.constant 0 : index
    %c0_12 = arith.constant 0 : index
    %16 = vector.load %arg7[%c0_11, %c0_12] : memref<1x128xf32, #tpu.memory_space<vmem>>, vector<1x128xf32>
    tpu.vector_store %arg7[%c0_11, %c0_12], %15 {strides = array<i32>} : memref<1x128xf32, #tpu.memory_space<vmem>>, vector<1x128xf32>,
    %c0_i32_13 = arith.constant 0 : i32
    %17 = arith.cmpi eq, %arg2, %c0_i32_13 : i32
    %18 = arith.extui %17 : i1 to i32
    %c0_i32_14 = arith.constant 0 : i32
    %19 = arith.cmpi ne, %18, %c0_i32_14 : i32
    scf.if %19 {
      %c0_15 = arith.constant 0 : index
      %c0_16 = arith.constant 0 : index
      %20 = vector.load %arg7[%c0_15, %c0_16] : memref<1x128xf32, #tpu.memory_space<vmem>>, vector<1x128xf32>
      %cst_17 = arith.constant 3.906250e-03 : f32
      %21 = vector.broadcast %cst_17 : f32 to vector<1x128xf32>
      %22 = arith.mulf %20, %21 : vector<1x128xf32>
      %c0_18 = arith.constant 0 : index
      %c0_19 = arith.constant 0 : index
      %c0_20 = arith.constant 0 : index
      %23 = vector.load %arg6[%c0_18, %c0_19, %c0_20] : memref<1x1x128xf32, #tpu.memory_space<vmem>>, vector<1x1x128xf32>
      %24 = vector.shape_cast %23 : vector<1x1x128xf32> to vector<1x128xf32>
      %25 = vector.shape_cast %22 : vector<1x128xf32> to vector<1x1x128xf32>
      tpu.vector_store %arg6[%c0_18, %c0_19, %c0_20], %25 {strides = array<i32>} : memref<1x1x128xf32, #tpu.memory_space<vmem>>, vector<1x1x128xf32>,
    } else {
    }
    return
  }
  func.func @transform_0(%arg0: i32, %arg1: i32, %arg2: i32) -> (i32, i32, i32) {
    %c0_i32 = arith.constant 0 : i32
    %c0_i32_0 = arith.constant 0 : i32
    return %arg0, %arg2, %c0_i32 : i32, i32, i32
  }
  func.func @transform_1(%arg0: i32, %arg1: i32, %arg2: i32) -> (i32, i32) {
    %c0_i32 = arith.constant 0 : i32
    %c0_i32_0 = arith.constant 0 : i32
    return %c0_i32, %arg1 : i32, i32
  }
  func.func @transform_2(%arg0: i32, %arg1: i32, %arg2: i32) -> (i32, i32) {
    %c0_i32 = arith.constant 0 : i32
    %c0_i32_0 = arith.constant 0 : i32
    return %c0_i32, %arg1 : i32, i32
  }
  func.func @transform_3(%arg0: i32, %arg1: i32, %arg2: i32) -> (i32, i32, i32) {
    %c0_i32 = arith.constant 0 : i32
    %c0_i32_0 = arith.constant 0 : i32
    return %arg0, %c0_i32, %arg1 : i32, i32, i32
  }
}

</mosaic_0001>

<bundles_post_ra>
// kernel: tpu_custom_call.1
= control target key start
LH: loop header
LB: loop body
LE: loop exit
PB: predicated region body
PF: predicated region fallthrough
CT: control target
= control target key end

     0   :  { %8 = vsyncpa [#allocation4], 0  ;;  %s1523_s0 = inlined_call_operand.hbm [shape: bf16[2,256,128], index: 0, kind: input, shape index: {}]   ;;  %s1524_s1 = inlined_call_operand.hbm [shape: bf16[128,128], index: 1, kind: input, shape index: {}]   ;;  %s1525_s2 = inlined_call_operand.vmem [shape: f32[1,128], index: 2, kind: input, shape index: {}]   ;;  %s1526_s3 = inlined_call_operand.hbm [shape: f32[2,1,128], index: 3, kind: output, shape index: {}]  }
   0x1   :  { %10 = vsyncpa [#allocation4 + $0x1], 0 }
   0x2   :  { %11 = vsyncpa [#allocation7], 0 }
   0x3   :  { %12 = vsyncpa [#allocation5], 0 }
   0x4   :  { %14 = vsyncpa [#allocation5 + $0x1], 0  ;;  %s1214_s12 = smov 0   ;;  %s1216_s13 = smov 0  }
   0x5   :  { %s1218_s14 = smov 0   ;;  %s1220_s15 = smov 0  }
   0x6   :  { %s1222_s16 = smov 0   ;;  %s1224_s17 = smov 0  }
   0x7 LB: > { %s813_s18 = sadd.s32 4294967295, %s1186_s17   ;;  %s814_s19 = sadd.s32 4294967294, %s1186_s17   ;;  %s1186_s17 = sphi %s1224_s17, %s20_s17   ;;  %s1182_s16 = sphi %s1222_s16, %s1550_s16   ;;  %s1178_s15 = sphi %s1220_s15, %s1549_s15   ;;  %s1174_s14 = sphi %s1218_s14, %s1548_s14   ;;  %s1170_s13 = sphi %s1216_s13, %s1547_s13   ;;  %s1166_s12 = sphi %s1214_s12, %s1546_s12  }
   0x8   : > { %p61_p0 = scmp.ne.s32.totalorder %s1170_s13, %s1166_s12  ;;  %p1248_p1 = scmp.eq.s32.totalorder %s813_s18, 0 }
   0x9   : > { %p1252_p2 = scmp.eq.s32.totalorder %s813_s18, 1  ;;  %p145_p3 = scmp.eq.s32.totalorder %s814_s19, 1 }
   0xa   : > { %s1531_s20 = scalar_select %p1248_p1, 1, 0 }
   0xb   : > { %s1532_s21 = scalar_select %p1252_p2, 1, 0 }
   0xc   : > { %p1258_p4 = por %p1248_p1, %p61_p0  ;;  %p815_p5 = scmp.ge.s32.totalorder %s1186_s17, 1 }
   0xd   : > { %p1263_p6 = por %p145_p3, %p61_p0  ;;  %p152_p7 = scmp.lt.s32.totalorder %s1186_s17, 3 }
   0xe   : > { %s1533_s22 = scalar_select %p1258_p4, 1, 0 }
   0xf   : > { %s1534_s23 = scalar_select %p1263_p6, 1, 0 }
  0x10   : > { %p1268_p8 = pnand %p815_p5, %p152_p7  ;;  %s1188_s25 = smov [#allocation6]  }
  0x11   : > { %s166_s26 = sshll.u32 %s1188_s25, 4  ;;  %s39_s28 = sadd.s32 1, %s1182_s16  ;;  %s167_s26 = int_to_ptr.vmem [resolvable:$true] %s166_s26 }
  0x12   : > { %s1535_s24 = scalar_select %p1268_p8, 1, 0 }
  0x13   : > { %p950_p9 = pneg %p1268_p8  ;;  %s1042_s4 = scalar_lea.hbm %s1524_s1, 1024 }
  0x14   : > { %p1043_p12 = scmp.ne.s32.totalorder %s1524_s1, %s1042_s4  ;;  %p1049_p5 = scmp.lt.u32.totalorder %s1042_s4, %s1524_s1 }
  0x15   : > { %p1277_p11 = pnand %p950_p9, %p1248_p1 }
  0x17   : > { %p1044_p13 = pneg %p1277_p11 }
  0x19   : > { %p1045_p0 = pnand %p1044_p13, %p1043_p12 }
  0x1b   : > { %p1046_p3 = pneg %p1045_p0 }
  0x1d   : > { %p1051_p7 = pnand %p1049_p5, %p1046_p3 }
  0x1f   : > { %1054 = shalt.err (!%p1051_p7)
}
  0x20   : > { %s1055_s9 = scalar_lea.vmem %s167_s26, 1024  ;;  %p1063_p1 = scmp.lt.s32.totalorder %s167_s26, %s167_s26 }
  0x21   : > { %p1056_p9 = scmp.ne.s32.totalorder %s167_s26, %s1055_s9  ;;  %p1064_p4 = scmp.lt.s32.totalorder %s1055_s9, %s1055_s9 }
  0x23   : > { %p1058_p10 = pnand %p1056_p9, %p1044_p13  ;;  %p1065_p8 = por %p1064_p4, %p1063_p1 }
  0x25   : > { %p1059_p6 = pneg %p1058_p10 }
  0x27   : > { %p1066_p2 = pnand %p1065_p8, %p1059_p6 }
  0x29   : > { %1069 = shalt.err (!%p1066_p2)
}
  0x2a   : > { %s1189_s10 = smov 64   ;;  %s1190_s11 = smov 4  }
  0x2b   : > { %953 = dma.hbm_to_vmem [thread:$0]  (!%p1277_p11), %s1524_s1, 1024, %s167_s26, [#allocation7], %s1189_s10, %s1189_s10, %s1190_s11  }
  0x2c   : > { %p41_p1 = scmp.ge.s32.totalorder %s39_s28, 2  ;;  %s48_s25 = sadd.s32 1, %s1174_s14 }
  0x2d   : > { %p55_p2 = scmp.ne.s32.totalorder %s1174_s14, %s1170_s13  ;;  %p56_p4 = scmp.eq.s32.totalorder %s1186_s17, 0 }
  0x2e   : > { %s1552_s28 = smov (%p41_p1, %s39_s28), 0  ;;  %p1538_p8 = scmp.ne.s32.totalorder %s1532_s21, 0 }
  0x2f   : > { %p1307_p6 = por %p56_p4, %p55_p2  ;;  %s43_s30 = ssub.s32 %s1182_s16, %s1552_s28 }
  0x30   : > { %p1313_p10 = por %p1538_p8, %p55_p2  ;;  %p963_p12 = scmp.lt.s32.totalorder %s1186_s17, 2 }
  0x31   : > { %p46_p11 = scmp.eq.s32.totalorder %s43_s30, 0  ;;  %s186_s26 = sand.u32 1, %s1174_s14  }
  0x32   : > { %s819_s4 = sshll.u32 %s186_s26, 7  ;;  %s853_s6 = sshll.u32 %s1182_s16, 11 }
  0x33   : > { %s1322_s5 = scalar_select %p46_p11, %s1174_s14, %s48_s25  }
  0x34   : > { %s1328_s9 = scalar_lea.hbm %s1523_s0, %s853_s6  ;;  %s190_s21 = scalar_lea.vmem [#allocation3], %s819_s4 }
  0x35   : > { %s199_s18 = sshll.u32 %s190_s21, 4  ;;  %p1334_p13 = pnand %p963_p12, %p1307_p6  ;;  %s1330_s18 = int_to_ptr.vmem [resolvable:$true] %s199_s18 }
  0x36   : > { %s1338_s25 = scalar_lea.sflag [#allocation4], %s186_s26  ;;  %s1070_s30 = scalar_lea.hbm %s1328_s9, 2048 }
  0x37   : > { %p1071_p0 = scmp.ne.s32.totalorder %s1328_s9, %s1070_s30  ;;  %p1072_p3 = pneg %p1334_p13 }
  0x38   : > { %s1075_s29 = scalar_lea.hbm %s1523_s0, 4096  ;;  %p1076_p9 = scmp.lt.u32.totalorder %s1328_s9, %s1523_s0 }
  0x39   : > { %p1073_p5 = pnand %p1072_p3, %p1071_p0  ;;  %p1077_p1 = scmp.lt.u32.totalorder %s1075_s29, %s1070_s30 }
  0x3a   : > { %p1079_p4 = scmp.lt.u32.totalorder %s1070_s30, %s1328_s9 }
  0x3b   : > { %p1074_p7 = pneg %p1073_p5  ;;  %p1078_p2 = por %p1077_p1, %p1076_p9 }
  0x3d   : > { %p1080_p6 = por %p1079_p4, %p1078_p2 }
  0x3f   : > { %p1081_p8 = pnand %p1080_p6, %p1074_p7 }
  0x41   : > { %1084 = shalt.err (!%p1081_p8)
}
  0x42   : > { %s1085_s26 = scalar_lea.vmem %s1330_s18, 2048  ;;  %s1191_s21 = smov [#allocation3]  }
  0x43   : > { %p1086_p12 = scmp.ne.s32.totalorder %s1330_s18, %s1085_s26  ;;  %s1090_s4 = sshll.u32 %s1191_s21, 4  ;;  %s1091_s4 = int_to_ptr.vmem [resolvable:$false] %s1090_s4 }
  0x44   : > { %s1092_s6 = scalar_lea.vmem %s1091_s4, 4096  ;;  %p1093_p5 = scmp.lt.s32.totalorder %s1330_s18, %s1091_s4 }
  0x45   : > { %p1088_p11 = pnand %p1086_p12, %p1072_p3  ;;  %p1094_p9 = scmp.lt.s32.totalorder %s1092_s6, %s1085_s26 }
  0x47   : > { %p1089_p0 = pneg %p1088_p11  ;;  %p1095_p1 = por %p1094_p9, %p1093_p5 }
  0x49   : > { %p1096_p2 = pnand %p1095_p1, %p1089_p0 }
  0x4b   : > { %1099 = shalt.err (!%p1096_p2)
}
  0x4c   : > { %957 = dma.hbm_to_vmem [thread:$0]  (!%p1334_p13), %s1328_s9, 2048, %s1330_s18, %s1338_s25, %s1189_s10, %s1189_s10, %s1190_s11  }
  0x4d   : > { %p1541_p3 = scmp.ne.s32.totalorder %s1535_s24, 0 }
  0x4e   : > { %s1372_s30 = sand.u32 (!%p1541_p3), 1, %s1170_s13   ;;  %p1542_p7 = scmp.ne.s32.totalorder (!%p1541_p3), %s1533_s22, 0 }
  0x4f   : > { %211 = sbr.rel (%p1541_p3) target bundleno = 442 (0x1ba), region = 32  ;;  %s823_s29 = sshll.u32 (!%p1541_p3), %s1372_s30, 7 }
  0x50   : > { %s214_s7 = scalar_lea.sflag (!%p1541_p3), [#allocation4], %s1372_s30  ;;  %s1376_s8 = scalar_lea.vmem (!%p1541_p3), [#allocation3], %s823_s29 }
  0x56   : > { %1153 = dma.done.wait (%p1542_p7), %s214_s7, 2048  }
  0x57   : > { %1155 = vsyncadd (%p1542_p7), %s214_s7, 4294965248  ;;  %p1543_p13 = scmp.ne.s32.totalorder %s1531_s20, 0 }
  0x59   : > { %1157 = dma.done.wait (%p1543_p13), [#allocation7], 1024  }
  0x5a   : > { %1159 = vsyncadd (%p1543_p13), [#allocation7], 4294966272  ;;  %v1018_v0 = vld [vmem:[#allocation6] sm:$0xff]   ;;  %v1019_v1 = vld [vmem:[#allocation6 + $0x8] sm:$0xff]   ;;  %v1192_v24 = vmov 0.0   ;;  %s850_s24 = sshll.u32 %s1178_s15, 4 }
  0x5b   : > { %878 = vmatprep.subr.bf16.mxu0 %v1018_v0  ;;  %926 = vmatprep.subr.bf16.mxu1 %v1018_v0  ;;  %v1020_v2 = vld [vmem:[#allocation6 + $0x10] sm:$0xff]   ;;  %v1021_v3 = vld [vmem:[#allocation6 + $0x18] sm:$0xff]   ;;  %v1026_v4 = vld [vmem:[%s1376_s8] sm:$0xff]   ;;  %255 = vst [vmem:[#allocation2] sm:$0x1] %v1192_v24  ;;  %s245_s10 = scalar_lea.vmem [#allocation8], %s1372_s30  ;;  %s1474_s19 = scalar_lea.hbm %s1526_s3, %s850_s24 }
  0x5c   : > { %879 = vmatpush3.bf16.msra.mxu0 %v1018_v0  ;;  %934 = vmatpush3.bf16.msra.mxu1 %v1018_v0  ;;  %v1022_v5 = vld [vmem:[#allocation6 + $0x20] sm:$0xff]   ;;  %v1023_v6 = vld [vmem:[#allocation6 + $0x28] sm:$0xff]   ;;  %v1024_v8 = vld [vmem:[#allocation6 + $0x30] sm:$0xff]   ;;  %s708_s11 = sshll.u32 %s245_s10, 4  ;;  %s695_s25 = scalar_lea.sflag [#allocation5], %s1372_s30  ;;  %s1476_s11 = int_to_ptr.vmem [resolvable:$true] %s708_s11 }
  0x5d   : > { %880 = vmatprep.subr.bf16.mxu0 %v1019_v1  ;;  %927 = vmatprep.subr.bf16.mxu1 %v1019_v1  ;;  %v1034_v7 = vld [vmem:[%s1376_s8 + $0x40] sm:$0xff]   ;;  %v1025_v9 = vld [vmem:[#allocation6 + $0x38] sm:$0xff]   ;;  %v1027_v10 = vld [vmem:[%s1376_s8 + $0x8] sm:$0xff]   ;;  %s1100_s26 = scalar_lea.vmem %s1476_s11, 16  ;;  %s1193_s15 = smov [#allocation8]  }
  0x5e   : > { %894 = vmatprep.mubr.bf16.mxu0 %v1026_v4  ;;  %910 = vmatprep.mubr.bf16.mxu1 %v1034_v7  ;;  %v1035_v11 = vld [vmem:[%s1376_s8 + $0x48] sm:$0xff]   ;;  %v1028_v12 = vld [vmem:[%s1376_s8 + $0x10] sm:$0xff]   ;;  %v1029_v14 = vld [vmem:[%s1376_s8 + $0x18] sm:$0xff]   ;;  %p1101_p4 = scmp.ne.s32.totalorder %s1476_s11, %s1100_s26  ;;  %s1104_s21 = sshll.u32 %s1193_s15, 4  ;;  %s1105_s21 = int_to_ptr.vmem [resolvable:$false] %s1104_s21 }
  0x5f   : > { %v1036_v13 = vld [vmem:[%s1376_s8 + $0x50] sm:$0xff]   ;;  %v1037_v15 = vld [vmem:[%s1376_s8 + $0x58] sm:$0xff]   ;;  %v1030_v16 = vld [vmem:[%s1376_s8 + $0x20] sm:$0xff]   ;;  %s1106_s4 = scalar_lea.vmem %s1105_s21, 32  ;;  %p1107_p12 = scmp.lt.s32.totalorder %s1476_s11, %s1105_s21 }
  0x60   : > { %881 = vmatpush3.bf16.msra.mxu0 %v1019_v1  ;;  %935 = vmatpush3.bf16.msra.mxu1 %v1019_v1  ;;  %v1038_v17 = vld [vmem:[%s1376_s8 + $0x60] sm:$0xff]   ;;  %v1031_v18 = vld [vmem:[%s1376_s8 + $0x28] sm:$0xff]   ;;  %v1032_v20 = vld [vmem:[%s1376_s8 + $0x30] sm:$0xff]   ;;  %p1102_p6 = pnand %p1101_p4, %p1313_p10  ;;  %p1108_p11 = scmp.lt.s32.totalorder %s1106_s4, %s1100_s26 }
  0x61   : > { %882 = vmatprep.subr.bf16.mxu0 %v1020_v2  ;;  %928 = vmatprep.subr.bf16.mxu1 %v1020_v2  ;;  %v1039_v19 = vld [vmem:[%s1376_s8 + $0x68] sm:$0xff]   ;;  %v1040_v21 = vld [vmem:[%s1376_s8 + $0x70] sm:$0xff]   ;;  %v1033_v22 = vld [vmem:[%s1376_s8 + $0x38] sm:$0xff]  }
  0x62   : > { %v1041_v23 = vld [vmem:[%s1376_s8 + $0x78] sm:$0xff]   ;;  %p1103_p8 = pneg %p1102_p6  ;;  %p1109_p0 = por %p1108_p11, %p1107_p12 }
  0x63   : > { %v1405_v25 = vld [vmem:[%s1525_s2] ss:$0 sm:$0xff] }
  0x64   : > { %883 = vmatpush3.bf16.msra.mxu0 %v1020_v2  ;;  %936 = vmatpush3.bf16.msra.mxu1 %v1020_v2  ;;  %p1110_p5 = pnand %p1109_p0, %p1103_p8 }
  0x65   : > { %884 = vmatprep.subr.bf16.mxu0 %v1021_v3  ;;  %929 = vmatprep.subr.bf16.mxu1 %v1021_v3 }
  0x68   : > { %885 = vmatpush3.bf16.msra.mxu0 %v1021_v3  ;;  %937 = vmatpush3.bf16.msra.mxu1 %v1021_v3 }
  0x69   : > { %886 = vmatprep.subr.bf16.mxu0 %v1022_v5  ;;  %930 = vmatprep.subr.bf16.mxu1 %v1022_v5 }
  0x6c   : > { %887 = vmatpush3.bf16.msra.mxu0 %v1022_v5  ;;  %938 = vmatpush3.bf16.msra.mxu1 %v1022_v5 }
  0x6d   : > { %888 = vmatprep.subr.bf16.mxu0 %v1023_v6  ;;  %931 = vmatprep.subr.bf16.mxu1 %v1023_v6 }
  0x70   : > { %889 = vmatpush3.bf16.msra.mxu0 %v1023_v6  ;;  %939 = vmatpush3.bf16.msra.mxu1 %v1023_v6 }
  0x71   : > { %890 = vmatprep.subr.bf16.mxu0 %v1024_v8  ;;  %932 = vmatprep.subr.bf16.mxu1 %v1024_v8 }
  0x74   : > { %891 = vmatpush3.bf16.msra.mxu0 %v1024_v8  ;;  %940 = vmatpush3.bf16.msra.mxu1 %v1024_v8 }
  0x75   : > { %892 = vmatprep.subr.bf16.mxu0 %v1025_v9  ;;  %933 = vmatprep.subr.bf16.mxu1 %v1025_v9 }
  0x78   : > { %893 = vmatpush3.bf16.msra.mxu0 %v1025_v9  ;;  %941 = vmatpush3.bf16.msra.mxu1 %v1025_v9 }
  0x7b   : > { %895 = vmatmul.mubr.bf16.vlgmr.msra.gmra.mrb[0].mxu0 %v1027_v10  ;;  %911 = vmatmul.mubr.bf16.vlgmr.msra.gmra.mrb[0].mxu1 %v1035_v11 }
  0x7c   : > { %898 = vmatprep.mubr.bf16.mxu0 %v1028_v12  ;;  %914 = vmatprep.mubr.bf16.mxu1 %v1036_v13 }
  0x83   : > { %899 = vmatmul.mubr.bf16.gmra.mrb[4].mxu0 %v1029_v14  ;;  %915 = vmatmul.mubr.bf16.gmra.mrb[4].mxu1 %v1037_v15 }
  0x84   : > { %902 = vmatprep.mubr.bf16.mxu0 %v1030_v16  ;;  %918 = vmatprep.mubr.bf16.mxu1 %v1038_v17 }
  0x8b   : > { %903 = vmatmul.mubr.bf16.gmra.mrb[8].mxu0 %v1031_v18  ;;  %919 = vmatmul.mubr.bf16.gmra.mrb[8].mxu1 %v1039_v19 }
  0x8c   : > { %906 = vmatprep.mubr.bf16.mxu0 %v1032_v20  ;;  %922 = vmatprep.mubr.bf16.mxu1 %v1040_v21 }
  0x93   : > { %907 = vmatmul.mubr.bf16.gmra.mrb[12].mxu0 %v1033_v22  ;;  %923 = vmatmul.mubr.bf16.gmra.mrb[12].mxu1 %v1041_v23 }
 0x14e   : > { %v896_v26 = vpop.f32.mrb[0].mxu0  ;;  %v1407_v27 = vpop.f32.mrb[0].mxu1 }
 0x14f   : > { %v489_v28 = vpop.f32.mrb[1].mxu0  ;;  %v1409_v29 = vpop.f32.mrb[1].mxu1  ;;  %v498_v35 = vadd.f32 %v896_v26, %v1405_v25 }
 0x150   : > { %v490_v30 = vadd.f32 %v1405_v25, %v489_v28  ;;  %v897_v31 = vpop.f32.mrb[2].mxu0  ;;  %v1412_v32 = vpop.f32.mrb[2].mxu1 }
 0x151   : > { %v492_v33 = vpop.f32.mrb[3].mxu0  ;;  %v1414_v34 = vpop.f32.mrb[3].mxu1  ;;  %v501_v38 = vadd.f32 %v897_v31, %v1405_v25  ;;  %v618_v40 = vmax.f32 %v498_v35, 0.0 }
 0x152   : > { %v493_v36 = vadd.f32 %v1405_v25, %v492_v33  ;;  %v616_v37 = vmax.f32 %v490_v30, 0.0 }
 0x153   : > { %v619_v46 = vmax.f32 %v501_v38, 0.0 }
 0x154   : > { %v617_v39 = vmax.f32 %v493_v36, 0.0 }
 0x156   : > { %v649_v41 = vadd.f32 %v617_v39, %v616_v37  ;;  %v900_v42 = vpop.f32.mrb[4].mxu0  ;;  %v1419_v43 = vpop.f32.mrb[4].mxu1 }
 0x157   : > { %v505_v44 = vpop.f32.mrb[5].mxu0  ;;  %v1421_v45 = vpop.f32.mrb[5].mxu1  ;;  %v514_v53 = vadd.f32 %v900_v42, %v1405_v25 }
 0x158   : > { %v650_v47 = vadd.f32 %v649_v41, %v618_v40  ;;  %v506_v48 = vadd.f32 %v1405_v25, %v505_v44  ;;  %v901_v49 = vpop.f32.mrb[6].mxu0  ;;  %v1424_v50 = vpop.f32.mrb[6].mxu1  ;;  %v554_v41 = vadd.f32 %v1405_v25, %v1409_v29  ;;  %v570_v29 = vadd.f32 %v1405_v25, %v1421_v45 }
 0x159   : > { %v508_v51 = vpop.f32.mrb[7].mxu0  ;;  %v1426_v52 = vpop.f32.mrb[7].mxu1  ;;  %v517_v58 = vadd.f32 %v901_v49, %v1405_v25  ;;  %v622_v60 = vmax.f32 %v514_v53, 0.0  ;;  %v557_v49 = vadd.f32 %v1405_v25, %v1414_v34 }
 0x15a   : > { %v620_v54 = vmax.f32 %v506_v48, 0.0  ;;  %v651_v55 = vadd.f32 %v650_v47, %v619_v46  ;;  %v509_v56 = vadd.f32 %v1405_v25, %v508_v51  ;;  %v632_v48 = vmax.f32 %v554_v41, 0.0 }
 0x15b   : > { %v623_v2 = vmax.f32 %v517_v58, 0.0  ;;  %v562_v51 = vadd.f32 %v1407_v27, %v1405_v25  ;;  %v573_v34 = vadd.f32 %v1405_v25, %v1426_v52  ;;  %v578_v27 = vadd.f32 %v1419_v43, %v1405_v25 }
 0x15c   : > { %v652_v57 = vadd.f32 %v651_v55, %v620_v54  ;;  %v621_v59 = vmax.f32 %v509_v56, 0.0  ;;  %v565_v55 = vadd.f32 %v1412_v32, %v1405_v25  ;;  %v633_v56 = vmax.f32 %v557_v49, 0.0 }
 0x15d   : > { %v581_v32 = vadd.f32 %v1424_v50, %v1405_v25  ;;  %v638_v45 = vmax.f32 %v578_v27, 0.0 }
 0x15e   : > { %v653_v61 = vadd.f32 %v652_v57, %v621_v59  ;;  %v904_v62 = vpop.f32.mrb[8].mxu0  ;;  %v1431_v63 = vpop.f32.mrb[8].mxu1  ;;  %v634_v57 = vmax.f32 %v562_v51, 0.0  ;;  %v635_v59 = vmax.f32 %v565_v55, 0.0 }
 0x15f   : > { %v521_v0 = vpop.f32.mrb[9].mxu0  ;;  %v585_v1 = vpop.f32.mrb[9].mxu1  ;;  %v530_v9 = vadd.f32 %v904_v62, %v1405_v25  ;;  %v594_v52 = vadd.f32 %v1431_v63, %v1405_v25 }
 0x160   : > { %v654_v3 = vadd.f32 %v653_v61, %v622_v60  ;;  %v522_v4 = vadd.f32 %v1405_v25, %v521_v0  ;;  %v905_v5 = vpop.f32.mrb[10].mxu0  ;;  %v1434_v6 = vpop.f32.mrb[10].mxu1  ;;  %v636_v61 = vmax.f32 %v570_v29, 0.0 }
 0x161   : > { %v524_v7 = vpop.f32.mrb[11].mxu0  ;;  %v588_v8 = vpop.f32.mrb[11].mxu1  ;;  %v533_v14 = vadd.f32 %v905_v5, %v1405_v25  ;;  %v626_v16 = vmax.f32 %v530_v9, 0.0  ;;  %v639_v5 = vmax.f32 %v581_v32, 0.0 }
 0x162   : > { %v624_v10 = vmax.f32 %v522_v4, 0.0  ;;  %v655_v11 = vadd.f32 %v654_v3, %v623_v2  ;;  %v525_v12 = vadd.f32 %v1405_v25, %v524_v7  ;;  %v637_v2 = vmax.f32 %v573_v34, 0.0 }
 0x163   : > { %v627_v22 = vmax.f32 %v533_v14, 0.0  ;;  %v586_v3 = vadd.f32 %v1405_v25, %v585_v1  ;;  %v642_v14 = vmax.f32 %v594_v52, 0.0 }
 0x164   : > { %v656_v13 = vadd.f32 %v655_v11, %v624_v10  ;;  %v625_v15 = vmax.f32 %v525_v12, 0.0  ;;  %v589_v10 = vadd.f32 %v1405_v25, %v588_v8  ;;  %v597_v12 = vadd.f32 %v1434_v6, %v1405_v25 }
 0x165   : > { %v640_v9 = vmax.f32 %v586_v3, 0.0 }
 0x166   : > { %v657_v17 = vadd.f32 %v656_v13, %v625_v15  ;;  %v908_v18 = vpop.f32.mrb[12].mxu0  ;;  %v924_v19 = vpop.f32.mrb[12].mxu1  ;;  %v641_v13 = vmax.f32 %v589_v10, 0.0  ;;  %v643_v15 = vmax.f32 %v597_v12, 0.0 }
 0x167   : > { %v537_v20 = vpop.f32.mrb[13].mxu0  ;;  %v601_v21 = vpop.f32.mrb[13].mxu1  ;;  %v546_v33 = vadd.f32 %v908_v18, %v1405_v25  ;;  %v610_v8 = vadd.f32 %v924_v19, %v1405_v25  ;;  %v648_v19 = vld [vmem:[#allocation2] sm:$0x1] }
 0x168   : > { %v658_v23 = vadd.f32 %v657_v17, %v626_v16  ;;  %v538_v24 = vadd.f32 %v1405_v25, %v537_v20  ;;  %v909_v26 = vpop.f32.mrb[14].mxu0  ;;  %v925_v28 = vpop.f32.mrb[14].mxu1  ;;  %v602_v50 = vadd.f32 %v1405_v25, %v601_v21 }
 0x169   : > { %v540_v30 = vpop.f32.mrb[15].mxu0  ;;  %v604_v31 = vpop.f32.mrb[15].mxu1  ;;  %v549_v39 = vadd.f32 %v909_v26, %v1405_v25  ;;  %v630_v42 = vmax.f32 %v546_v33, 0.0  ;;  %v613_v63 = vadd.f32 %v925_v28, %v1405_v25  ;;  %v646_v6 = vmax.f32 %v610_v8, 0.0 }
 0x16a   : > { %v628_v35 = vmax.f32 %v538_v24, 0.0  ;;  %v659_v36 = vadd.f32 %v658_v23, %v627_v22  ;;  %v541_v37 = vadd.f32 %v1405_v25, %v540_v30  ;;  %v644_v17 = vmax.f32 %v602_v50, 0.0 }
 0x16b   : > { %v631_v46 = vmax.f32 %v549_v39, 0.0  ;;  %v605_v18 = vadd.f32 %v1405_v25, %v604_v31  ;;  %v647_v26 = vmax.f32 %v613_v63, 0.0 }
 0x16c   : > { %v660_v38 = vadd.f32 %v659_v36, %v628_v35  ;;  %v629_v40 = vmax.f32 %v541_v37, 0.0 }
 0x16d   : > { %v645_v23 = vmax.f32 %v605_v18, 0.0 }
 0x16e   : > { %v661_v44 = vadd.f32 %v660_v38, %v629_v40 }
 0x170   : > { %v662_v47 = vadd.f32 %v661_v44, %v630_v42 }
 0x172   : > { %v663_v53 = vadd.f32 %v662_v47, %v631_v46 }
 0x174   : > { %v664_v54 = vadd.f32 %v663_v53, %v632_v48 }
 0x176   : > { %v665_v58 = vadd.f32 %v664_v54, %v633_v56 }
 0x178   : > { %v666_v60 = vadd.f32 %v665_v58, %v634_v57 }
 0x17a   : > { %v667_v62 = vadd.f32 %v666_v60, %v635_v59 }
 0x17c   : > { %v668_v0 = vadd.f32 %v667_v62, %v636_v61 }
 0x17e   : > { %v669_v4 = vadd.f32 %v668_v0, %v637_v2 }
 0x180   : > { %v670_v7 = vadd.f32 %v669_v4, %v638_v45 }
 0x182   : > { %v671_v11 = vadd.f32 %v670_v7, %v639_v5 }
 0x184   : > { %v672_v43 = vadd.f32 %v671_v11, %v640_v9 }
 0x186   : > { %v673_v1 = vadd.f32 %v672_v43, %v641_v13 }
 0x188   : > { %v674_v16 = vadd.f32 %v673_v1, %v642_v14 }
 0x18a   : > { %v675_v20 = vadd.f32 %v674_v16, %v643_v15 }
 0x18c   : > { %v676_v22 = vadd.f32 %v675_v20, %v644_v17 }
 0x18e   : > { %v677_v24 = vadd.f32 %v676_v22, %v645_v23 }
 0x190   : > { %v678_v21 = vadd.f32 %v677_v24, %v646_v6 }
 0x192   : > { %v679_v30 = vadd.f32 %v678_v21, %v647_v26 }
 0x194   : > { %v680_v33 = vrot.slane %v679_v30, 4 }
 0x196   : > { %v681_v35 = vadd.f32 %v680_v33, %v679_v30 }
 0x198   : > { %v682_v36 = vrot.slane %v681_v35, 2 }
 0x19a   : > { %v683_v37 = vadd.f32 %v682_v36, %v681_v35 }
 0x19c   : > { %v684_v31 = vrot.slane %v683_v37, 1 }
 0x19e   : > { %v685_v38 = vadd.f32 %v684_v31, %v683_v37 }
 0x1a0   : > { %v686_v39 = vadd.f32 %v685_v38, %v648_v19 }
 0x1a2   : > { %687 = vst [vmem:[#allocation2] sm:$0x1] %v686_v39 }
 0x1a9   : > { %v691_v25 = vld [vmem:[#allocation2] sm:$0x1] }
 0x1aa   : > { %v692_v28 = vmul.f32 0.00390625, %v691_v25 }
 0x1ac   : > { %693 = vst [vmem:[%s245_s10] sm:$0x1] %v692_v28 }
 0x1ad   : > { %1113 = shalt.err (!%p1110_p5)
}
 0x1ae   : > { %s1114_s6 = scalar_lea.hbm %s1474_s19, 16  ;;  %s1118_s7 = scalar_lea.hbm %s1526_s3, 32 }
 0x1af   : > { %p1115_p9 = scmp.ne.s32.totalorder %s1474_s19, %s1114_s6  ;;  %p1119_p3 = scmp.lt.u32.totalorder %s1474_s19, %s1526_s3 }
 0x1b0   : > { %p1120_p7 = scmp.lt.u32.totalorder %s1118_s7, %s1114_s6  ;;  %p1122_p4 = scmp.lt.u32.totalorder %s1114_s6, %s1474_s19 }
 0x1b1   : > { %p1116_p1 = pnand %p1115_p9, %p1313_p10 }
 0x1b2   : > { %p1121_p13 = por %p1120_p7, %p1119_p3 }
 0x1b3   : > { %p1117_p2 = pneg %p1116_p1 }
 0x1b4   : > { %p1123_p6 = por %p1122_p4, %p1121_p13 }
 0x1b6   : > { %p1124_p8 = pnand %p1123_p6, %p1117_p2 }
 0x1b8   : > { %1127 = shalt.err (!%p1124_p8)
}
 0x1b9   : > { %948 = dma.vmem_to_hbm [thread:$0]  (%p1313_p10), %s1476_s11, 16, %s1474_s19, %s695_s25  }
 0x1ba PF: > { %s720_s22 = sand.u32 1, %s1166_s12   ;;  %p1544_p12 = scmp.ne.s32.totalorder %s1534_s23, 0 }
 0x1bb   : > { %p1545_p11 = scmp.ge.s32.totalorder %s1186_s17, 2  ;;  %s721_s24 = scalar_lea.sflag [#allocation5], %s720_s22 }
 0x1bd   : > { %p959_p0 = pnand %p1545_p11, %p1544_p12 }
 0x1bf   : > { %1161 = dma.done.wait (!%p959_p0), %s721_s24, 16  }
 0x1c0   : > { %1163 = vsyncadd (!%p959_p0), %s721_s24, 4294967280  ;;  %s20_s17 = sadd.s32 1, %s1186_s17   ;;  %s1546_s12 = smov %s1170_s13 }
 0x1c1   : > { %p17_p5 = scmp.ge.s32.totalorder %s20_s17, 4   ;;  %s1547_s13 = smov %s1174_s14 }
 0x1c2   : > { %s1548_s14 = smov %s1322_s5  ;;  %s1549_s15 = smov %s1182_s16 }
 0x1c3   : > { %s1550_s16 = smov %s1552_s28  ;;  %19 = sbr.rel (!%p17_p5) target bundleno = 7 (0x7), region = 93 }
 0x1ca   :  { %725 = vsyncpa [#allocation4], 1 }
 0x1cb   :  { %727 = vsyncpa [#allocation4 + $0x1], 1 }
 0x1cc   :  { %728 = vsyncpa [#allocation7], 1 }
 0x1cd   :  { %729 = vsyncpa [#allocation5], 1 }
 0x1ce   :  { %731 = vsyncpa [#allocation5 + $0x1], 1 }

</bundles_post_ra>
